<compile_context>
chip_gen: v7x
topology: tpu7x:2x2x1
jax: 0.10.0
libtpu: 0.0.40
codegen_flags: <defaults>
</compile_context>

<pallas_src>
import functools

import jax
import jax.numpy as jnp
from jax.experimental import pallas as pl
from jax.experimental.pallas import tpu as pltpu


def _round_up(a, b):
    return ((a + b - 1) // b) * b


# ----------------------------- Pallas kernel --------------------------------


def _fused_head_kernel(n_layers, hw, thw, mask_hw, x_ref, *refs):
    """Fused global-avg-pool + packed multi-task MLP heads.

    refs = (W0, b0, W1, b1, ..., W_{L-1}, b_{L-1}, o_ref, acc_ref)
      x_ref : (tn, C, thw)   input tile (bf16), spatial (HW) on the lane axis
      Wk    : packed bf16 weight slab (lane-dense, widths padded to 128)
      bk    : packed f32 bias, shape (1, out_pad_k)
      o_ref : (1, tn, out_pad) f32   padded logits for all tasks
      acc   : (tn, C) f32            pooled-sum accumulator (VMEM scratch)
    Grid = (N tiles ["parallel"], HW reduction tiles ["arbitrary"]).
    """
    *param_refs, o_ref, acc_ref = refs
    j = pl.program_id(1)

    @pl.when(j == 0)
    def _():
        acc_ref[...] = jnp.zeros_like(acc_ref)

    x = x_ref[...]
    if mask_hw:
        # Last HW block is partial: zero out-of-range lanes before summing.
        col = jax.lax.broadcasted_iota(jnp.int32, x.shape, 2) + j * thw
        x = jnp.where(col < hw, x, jnp.zeros_like(x))
    # Partial spatial sum (cross-lane reduce -> XLU), accumulated in f32.
    acc_ref[...] += jnp.sum(x.astype(jnp.float32), axis=-1)

    @pl.when(j == pl.num_programs(1) - 1)
    def _():
        # Pooled sums; 1/HW is folded into the layer-0 weights at pack time.
        h = acc_ref[...]
        for i in range(n_layers):
            w = param_refs[2 * i]           # bf16 weight slab ref
            b = param_refs[2 * i + 1][...]  # f32 bias
            # bf16 x bf16 -> f32 on the MXU; no f32 upcast of the weights.
            h = jnp.dot(h.astype(jnp.bfloat16), w[...],
                        preferred_element_type=jnp.float32) + b
            if i < n_layers - 1:
                h = jnp.maximum(h, 0.0)
        o_ref[...] = h[None].astype(o_ref.dtype)


# ------------------------------ wrapper glue ---------------------------------


def pack_task_params(mlp_params, head_params, num_classes, decoder_channels, hw):
    """Pack per-task weights into lane-dense (multiple-of-128) bf16 slabs.

    Layer 0 (shared pooled input): per-task weights concatenated along the
    output dim, with 1/HW folded in.  Deeper layers + classifier heads:
    block-diagonal so tasks stay independent.  Zero padding is exact through
    ReLU (zero cols -> zero activations -> zero rows).  Biases stay f32.

    Note: block-diagonal packing does ~n_tasks x extra FLOPs/bytes for the
    deeper layers; fine for a few small tasks, switch to per-task matmuls for
    many wide decoders (VMEM on v7x).
    """
    n_tasks = len(num_classes)
    nh = len(decoder_channels) if decoder_channels else 0
    layers = []
    for i in range(nh):
        layers.append([(mlp_params[t][2 * i], mlp_params[t][2 * i + 1])
                       for t in range(n_tasks)])
    layers.append([(head_params[t][0], head_params[t][1]) for t in range(n_tasks)])

    inv_hw = 1.0 / float(hw)
    packed = []
    prev_pad = None
    for li, layer in enumerate(layers):
        out_total = sum(w.shape[1] for (w, _) in layer)
        out_pad = _round_up(out_total, 128)
        if li == 0:
            # Shared pooled-sum input: concatenate along the output dim and
            # fold the mean's 1/HW into the weights.
            in_dim = layer[0][0].shape[0]
            W = jnp.zeros((in_dim, out_pad), jnp.float32)
            b = jnp.zeros((1, out_pad), jnp.float32)
            col = 0
            for (w, bb) in layer:
                W = W.at[:, col:col + w.shape[1]].set(w * inv_hw)
                b = b.at[:, col:col + w.shape[1]].set(bb)
                col += w.shape[1]
        else:
            W = jnp.zeros((prev_pad, out_pad), jnp.float32)
            b = jnp.zeros((1, out_pad), jnp.float32)
            row, col = 0, 0
            for (w, bb) in layer:
                W = W.at[row:row + w.shape[0], col:col + w.shape[1]].set(w)
                b = b.at[:, col:col + w.shape[1]].set(bb)
                row += w.shape[0]
                col += w.shape[1]
        packed.append((W.astype(jnp.bfloat16), b))
        prev_pad = out_pad

    offsets = []
    off = 0
    for nc in num_classes:
        offsets.append(off)
        off += nc
    return packed, offsets


def _choose_tiles(n, c, hw, in_itemsize, input_budget_bytes=12 << 20):
    """Pick (tn, thw).

    tn : >= 2 blocks on the parallel axis when N >= 2 (v7x megacore); multiple
         of 8 sublanes once N is large, capped at 256 (MXU-friendly M dim).
    thw: largest multiple of 128 whose double-buffered input tile fits the
         budget; if the whole spatial extent fits, a single full-extent block.
    """
    if n >= 2:
        half = -(-n // 2)
        tn = min(256, max(8, (half // 8) * 8)) if half >= 8 else half
    else:
        tn = 1
    max_thw = (input_budget_bytes // (2 * tn * c * in_itemsize)) // 128 * 128
    max_thw = max(128, min(max_thw, 4096))
    thw = hw if hw <= max_thw else max_thw
    return tn, thw


def simple_head_forward(x_nchw, packed_layers, logit_offsets, num_classes):
    """Equivalent of SimpleHead.forward (pool='Avg', list_input=False)."""
    n, c, h, w = x_nchw.shape
    hw = h * w
    # Stream activations in bf16 (halves HBM read traffic); accumulation is
    # f32 inside the kernel.  Ideally the backbone already emits bf16.
    if x_nchw.dtype != jnp.bfloat16:
        x_nchw = x_nchw.astype(jnp.bfloat16)
    x_flat = x_nchw.reshape(n, c, hw)          # zero-copy for contiguous NCHW

    tn, thw = _choose_tiles(n, c, hw, x_flat.dtype.itemsize)
    n_blocks = pl.cdiv(n, tn)
    hw_blocks = pl.cdiv(hw, thw)
    mask_hw = (hw % thw) != 0
    n_layers = len(packed_layers)
    out_pad = packed_layers[-1][0].shape[1]

    flat_params = []
    for (W, b) in packed_layers:
        flat_params.extend([W, b])

    # VMEM budget: double-buffered input tile + weight slabs (counted twice in
    # case single-buffering is unavailable) + resident output + accumulator.
    in_tile_bytes = tn * c * thw * x_flat.dtype.itemsize
    w_bytes = sum(int(a.size) * a.dtype.itemsize for a in flat_params)
    vmem_est = 2 * in_tile_bytes + 2 * w_bytes + 2 * tn * out_pad * 4 + tn * c * 4
    vmem_limit = int(min(64 << 20, max(32 << 20, vmem_est + (8 << 20))))

    kernel = functools.partial(_fused_head_kernel, n_layers, hw, thw, mask_hw)

    def make_call(weight_mode):
        def wspec(shape):
            nd = len(shape)
            if weight_mode is None:
                return pl.BlockSpec(shape, lambda i, j, nd=nd: (0,) * nd)
            return pl.BlockSpec(shape, lambda i, j, nd=nd: (0,) * nd,
                                pipeline_mode=weight_mode)

        return pl.pallas_call(
            kernel,
            out_shape=jax.ShapeDtypeStruct((n_blocks, tn, out_pad), jnp.float32),
            grid=(n_blocks, hw_blocks),        # (N tiles, HW reduction tiles)
            in_specs=[pl.BlockSpec((tn, c, thw), lambda i, j: (i, 0, j))]
                     + [wspec(p.shape) for p in flat_params],
            out_specs=pl.BlockSpec((1, tn, out_pad), lambda i, j: (i, 0, 0)),
            scratch_shapes=[pltpu.VMEM((tn, c), jnp.float32)],
            compiler_params=pltpu.CompilerParams(
                dimension_semantics=("parallel", "arbitrary"),
                vmem_limit_bytes=vmem_limit,
            ),
        )

    try:
        # Weight slabs have a constant index_map -> single-buffer them so they
        # are not double-buffered for nothing (halves weight VMEM footprint;
        # matters on v7x's 64 MiB VMEM for realistic decoder widths).
        logits = make_call(pl.Buffered(1))(x_flat, *flat_params)
        logits = jax.block_until_ready(logits)
    except Exception:
        # Fallback for jax versions without BlockSpec(pipeline_mode=...).
        logits = make_call(None)(x_flat, *flat_params)

    logits = logits.reshape(n_blocks * tn, out_pad)[:n]
    feats = [logits[:, off:off + nc]
             for off, nc in zip(logit_offsets, num_classes)]
    return (feats, feats)


# ----------------------------- parameter init --------------------------------


def init_linear(key, fan_in, fan_out):
    # PyTorch-style uniform(-1/sqrt(fan_in), ...); weight stored (in, out).
    kw, kb = jax.random.split(key)
    bound = 1.0 / jnp.sqrt(jnp.asarray(fan_in, jnp.float32))
    w = jax.random.uniform(kw, (fan_in, fan_out), jnp.float32, -bound, bound)
    b = jax.random.uniform(kb, (1, fan_out), jnp.float32, -bound, bound)
    return w, b


def init_simple_head(key, n_tasks, num_classes, input_channels, decoder_channels):
    mlp_params, head_params = [], []
    for t in range(n_tasks):
        key, *subs = jax.random.split(key, len(decoder_channels) + 2)
        layers = []
        prev = input_channels
        for i, dc in enumerate(decoder_channels):
            w, b = init_linear(subs[i], prev, dc)
            layers.extend([w, b])
            prev = dc
        penultimate = decoder_channels[-1] if decoder_channels else input_channels
        wh, bh = init_linear(subs[-1], penultimate, num_classes[t])
        mlp_params.append(layers)
        head_params.append([wh, bh])
    return mlp_params, head_params


# -------------------------------- references ---------------------------------


def packed_reference(x_bf16_nchw, packed_layers, offsets, num_classes):
    """Same packed/bf16 math as the kernel, computed with plain XLA ops."""
    h = jnp.sum(x_bf16_nchw.astype(jnp.float32), axis=(2, 3))  # pooled sums
    nl = len(packed_layers)
    for li, (W, b) in enumerate(packed_layers):
        h = jnp.dot(h.astype(jnp.bfloat16), W,
                    preferred_element_type=jnp.float32) + b
        if li < nl - 1:
            h = jnp.maximum(h, 0.0)
    return [h[:, off:off + nc] for off, nc in zip(offsets, num_classes)]


def reference_forward(x_nchw, mlp_params, head_params, num_classes, decoder_channels):
    """Faithful f32 per-task PyTorch semantics (no bf16 rounding)."""
    pooled = jnp.mean(x_nchw.astype(jnp.float32), axis=(2, 3))  # (N, C)
    outs = []
    for t in range(len(num_classes)):
        h = pooled
        for i in range(len(decoder_channels)):
            w, b = mlp_params[t][2 * i], mlp_params[t][2 * i + 1]
            h = jnp.maximum(h @ w + b, 0.0)
        wh, bh = head_params[t]
        outs.append(h @ wh + bh)
    return outs


# ----------------------------------- main -------------------------------------

if __name__ == "__main__":
    n_tasks = 2
    num_classes = [5, 3]
    input_channels = 4
    decoder_channels = [32, 32]
    N, H, W = 2, 16, 16

    key = jax.random.PRNGKey(0)
    kx, kp = jax.random.split(key)
    x_f32 = jax.random.normal(kx, (N, input_channels, H, W), jnp.float32)
    # Backbone activations arrive in bf16 (halves the pool phase's HBM read).
    x = x_f32.astype(jnp.bfloat16)

    mlp_params, head_params = init_simple_head(
        kp, n_tasks, num_classes, input_channels, decoder_channels)
    packed_layers, logit_offsets = pack_task_params(
        mlp_params, head_params, num_classes, decoder_channels, hw=H * W)

    feats, feats2 = simple_head_forward(x, packed_layers, logit_offsets, num_classes)
    feats = [jax.block_until_ready(f) for f in feats]

    # Check 1 (tight): same packed/bf16 math as the kernel, via plain XLA.
    ref_packed = packed_reference(x, packed_layers, logit_offsets, num_classes)
    for f, r in zip(feats, ref_packed):
        assert jnp.allclose(f, r, atol=2e-3, rtol=2e-3), "mismatch vs packed ref"

    # Check 2 (loose): faithful f32 per-task reference; tolerance accounts for
    # bf16 rounding of activations and weights.
    ref_f32 = reference_forward(x_f32, mlp_params, head_params,
                                num_classes, decoder_channels)
    for f, r, nc in zip(feats, ref_f32, num_classes):
        assert f.shape == (N, nc), f.shape
        assert jnp.allclose(f, r, atol=5e-2, rtol=5e-2), "mismatch vs f32 ref"

    # forward() returns (feats, feats)
    assert feats2 is not None and len(feats2) == n_tasks

    print("KERNEL_OK")
</pallas_src>

<mosaic_0001>
module attributes {stable_mosaic.version = 11 : i64} {
  func.func @_fused_head_kernel(%arg0: i32, %arg1: i32, %arg2: memref<1x4x256xbf16, #tpu.memory_space<vmem>>, %arg3: memref<4x128xbf16, #tpu.memory_space<vmem>>, %arg4: memref<1x128xf32, #tpu.memory_space<vmem>>, %arg5: memref<128x128xbf16, #tpu.memory_space<vmem>>, %arg6: memref<1x128xf32, #tpu.memory_space<vmem>>, %arg7: memref<128x128xbf16, #tpu.memory_space<vmem>>, %arg8: memref<1x128xf32, #tpu.memory_space<vmem>>, %arg9: memref<1x1x128xf32, #tpu.memory_space<vmem>>, %arg10: memref<1x4xf32, #tpu.memory_space<vmem>>) attributes {dimension_semantics = [#tpu.dimension_semantics<parallel>, #tpu.dimension_semantics<arbitrary>], iteration_bounds = array<i64: 2, 1>, scalar_prefetch = 0 : i64, scratch_operands = 1 : i64, tpu.core_type = #tpu.core_type<tc>, window_params = [{transform_indices = @transform_0, window_bounds = array<i64: 1, 4, 256>}, {pipeline_mode = #tpu.pipeline_mode<synchronous>, transform_indices = @transform_1, window_bounds = array<i64: 4, 128>}, {pipeline_mode = #tpu.pipeline_mode<synchronous>, transform_indices = @transform_2, window_bounds = array<i64: 1, 128>}, {pipeline_mode = #tpu.pipeline_mode<synchronous>, transform_indices = @transform_3, window_bounds = array<i64: 128, 128>}, {pipeline_mode = #tpu.pipeline_mode<synchronous>, transform_indices = @transform_4, window_bounds = array<i64: 1, 128>}, {pipeline_mode = #tpu.pipeline_mode<synchronous>, transform_indices = @transform_5, window_bounds = array<i64: 128, 128>}, {pipeline_mode = #tpu.pipeline_mode<synchronous>, transform_indices = @transform_6, window_bounds = array<i64: 1, 128>}, {transform_indices = @transform_7, window_bounds = array<i64: 1, 1, 128>}]} {
    %c0_i32 = arith.constant 0 : i32
    %0 = arith.cmpi eq, %arg1, %c0_i32 : i32
    %1 = arith.extui %0 : i1 to i32
    %c0_i32_0 = arith.constant 0 : i32
    %2 = arith.cmpi ne, %1, %c0_i32_0 : i32
    scf.if %2 {
      %cst_9 = arith.constant 0.000000e+00 : f32
      %12 = vector.broadcast %cst_9 : f32 to vector<1x4xf32>
      %c0_10 = arith.constant 0 : index
      %c0_11 = arith.constant 0 : index
      %13 = vector.load %arg10[%c0_10, %c0_11] : memref<1x4xf32, #tpu.memory_space<vmem>>, vector<1x4xf32>
      tpu.vector_store %arg10[%c0_10, %c0_11], %12 {strides = array<i32>} : memref<1x4xf32, #tpu.memory_space<vmem>>, vector<1x4xf32>,
    } else {
    }
    %c0 = arith.constant 0 : index
    %c0_1 = arith.constant 0 : index
    %c0_2 = arith.constant 0 : index
    %3 = vector.load %arg2[%c0, %c0_1, %c0_2] : memref<1x4x256xbf16, #tpu.memory_space<vmem>>, vector<1x4x256xbf16>
    %c0_3 = arith.constant 0 : index
    %c0_4 = arith.constant 0 : index
    %4 = vector.load %arg10[%c0_3, %c0_4] : memref<1x4xf32, #tpu.memory_space<vmem>>, vector<1x4xf32>
    %5 = arith.extf %3 : vector<1x4x256xbf16> to vector<1x4x256xf32>
    %cst = arith.constant dense<0.000000e+00> : vector<1x4xf32>
    %6 = vector.multi_reduction <add>, %5, %cst [2] : vector<1x4x256xf32> to vector<1x4xf32>
    %7 = arith.addf %4, %6 : vector<1x4xf32>
    %c0_5 = arith.constant 0 : index
    %c0_6 = arith.constant 0 : index
    %8 = vector.load %arg10[%c0_5, %c0_6] : memref<1x4xf32, #tpu.memory_space<vmem>>, vector<1x4xf32>
    tpu.vector_store %arg10[%c0_5, %c0_6], %7 {strides = array<i32>} : memref<1x4xf32, #tpu.memory_space<vmem>>, vector<1x4xf32>,
    %c0_i32_7 = arith.constant 0 : i32
    %9 = arith.cmpi eq, %arg1, %c0_i32_7 : i32
    %10 = arith.extui %9 : i1 to i32
    %c0_i32_8 = arith.constant 0 : i32
    %11 = arith.cmpi ne, %10, %c0_i32_8 : i32
    scf.if %11 {
      %c0_9 = arith.constant 0 : index
      %c0_10 = arith.constant 0 : index
      %12 = vector.load %arg10[%c0_9, %c0_10] : memref<1x4xf32, #tpu.memory_space<vmem>>, vector<1x4xf32>
      %c0_11 = arith.constant 0 : index
      %c0_12 = arith.constant 0 : index
      %13 = vector.load %arg4[%c0_11, %c0_12] : memref<1x128xf32, #tpu.memory_space<vmem>>, vector<1x128xf32>
      %14 = arith.truncf %12 : vector<1x4xf32> to vector<1x4xbf16>
      %c0_13 = arith.constant 0 : index
      %c0_14 = arith.constant 0 : index
      %15 = vector.load %arg3[%c0_13, %c0_14] : memref<4x128xbf16, #tpu.memory_space<vmem>>, vector<4x128xbf16>
      %cst_15 = arith.constant dense<0.000000e+00> : vector<1x128xf32>
      %16 = tpu.matmul %14, %15, %cst_15 {dimension_numbers = #tpu.dot_dimension_numbers<[1], [0], [0], [1], [0, 0, 1, 1], [], []>} : vector<1x4xbf16>, vector<4x128xbf16>, vector<1x128xf32> -> vector<1x128xf32>
      %17 = arith.addf %16, %13 : vector<1x128xf32>
      %cst_16 = arith.constant 0.000000e+00 : f32
      %18 = vector.broadcast %cst_16 : f32 to vector<1x128xf32>
      %19 = arith.maximumf %17, %18 : vector<1x128xf32>
      %c0_17 = arith.constant 0 : index
      %c0_18 = arith.constant 0 : index
      %20 = vector.load %arg6[%c0_17, %c0_18] : memref<1x128xf32, #tpu.memory_space<vmem>>, vector<1x128xf32>
      %21 = arith.truncf %19 : vector<1x128xf32> to vector<1x128xbf16>
      %c0_19 = arith.constant 0 : index
      %c0_20 = arith.constant 0 : index
      %22 = vector.load %arg5[%c0_19, %c0_20] : memref<128x128xbf16, #tpu.memory_space<vmem>>, vector<128x128xbf16>
      %cst_21 = arith.constant dense<0.000000e+00> : vector<1x128xf32>
      %23 = tpu.matmul %21, %22, %cst_21 {dimension_numbers = #tpu.dot_dimension_numbers<[1], [0], [0], [1], [0, 0, 1, 1], [], []>} : vector<1x128xbf16>, vector<128x128xbf16>, vector<1x128xf32> -> vector<1x128xf32>
      %24 = arith.addf %23, %20 : vector<1x128xf32>
      %cst_22 = arith.constant 0.000000e+00 : f32
      %25 = vector.broadcast %cst_22 : f32 to vector<1x128xf32>
      %26 = arith.maximumf %24, %25 : vector<1x128xf32>
      %c0_23 = arith.constant 0 : index
      %c0_24 = arith.constant 0 : index
      %27 = vector.load %arg8[%c0_23, %c0_24] : memref<1x128xf32, #tpu.memory_space<vmem>>, vector<1x128xf32>
      %28 = arith.truncf %26 : vector<1x128xf32> to vector<1x128xbf16>
      %c0_25 = arith.constant 0 : index
      %c0_26 = arith.constant 0 : index
      %29 = vector.load %arg7[%c0_25, %c0_26] : memref<128x128xbf16, #tpu.memory_space<vmem>>, vector<128x128xbf16>
      %cst_27 = arith.constant dense<0.000000e+00> : vector<1x128xf32>
      %30 = tpu.matmul %28, %29, %cst_27 {dimension_numbers = #tpu.dot_dimension_numbers<[1], [0], [0], [1], [0, 0, 1, 1], [], []>} : vector<1x128xbf16>, vector<128x128xbf16>, vector<1x128xf32> -> vector<1x128xf32>
      %31 = arith.addf %30, %27 : vector<1x128xf32>
      %32 = vector.shape_cast %31 : vector<1x128xf32> to vector<1x1x128xf32>
      %c0_28 = arith.constant 0 : index
      %c0_29 = arith.constant 0 : index
      %c0_30 = arith.constant 0 : index
      %33 = vector.load %arg9[%c0_28, %c0_29, %c0_30] : memref<1x1x128xf32, #tpu.memory_space<vmem>>, vector<1x1x128xf32>
      tpu.vector_store %arg9[%c0_28, %c0_29, %c0_30], %32 {strides = array<i32>} : memref<1x1x128xf32, #tpu.memory_space<vmem>>, vector<1x1x128xf32>,
    } else {
    }
    return
  }
  func.func @transform_0(%arg0: i32, %arg1: i32) -> (i32, i32, i32) {
    %c0_i32 = arith.constant 0 : i32
    %c0_i32_0 = arith.constant 0 : i32
    return %arg0, %c0_i32, %arg1 : i32, i32, i32
  }
  func.func @transform_1(%arg0: i32, %arg1: i32) -> (i32, i32) {
    %c0_i32 = arith.constant 0 : i32
    %c0_i32_0 = arith.constant 0 : i32
    %c0_i32_1 = arith.constant 0 : i32
    return %c0_i32, %c0_i32_0 : i32, i32
  }
  func.func @transform_2(%arg0: i32, %arg1: i32) -> (i32, i32) {
    %c0_i32 = arith.constant 0 : i32
    %c0_i32_0 = arith.constant 0 : i32
    %c0_i32_1 = arith.constant 0 : i32
    return %c0_i32, %c0_i32_0 : i32, i32
  }
  func.func @transform_3(%arg0: i32, %arg1: i32) -> (i32, i32) {
    %c0_i32 = arith.constant 0 : i32
    %c0_i32_0 = arith.constant 0 : i32
    %c0_i32_1 = arith.constant 0 : i32
    return %c0_i32, %c0_i32_0 : i32, i32
  }
  func.func @transform_4(%arg0: i32, %arg1: i32) -> (i32, i32) {
    %c0_i32 = arith.constant 0 : i32
    %c0_i32_0 = arith.constant 0 : i32
    %c0_i32_1 = arith.constant 0 : i32
    return %c0_i32, %c0_i32_0 : i32, i32
  }
  func.func @transform_5(%arg0: i32, %arg1: i32) -> (i32, i32) {
    %c0_i32 = arith.constant 0 : i32
    %c0_i32_0 = arith.constant 0 : i32
    %c0_i32_1 = arith.constant 0 : i32
    return %c0_i32, %c0_i32_0 : i32, i32
  }
  func.func @transform_6(%arg0: i32, %arg1: i32) -> (i32, i32) {
    %c0_i32 = arith.constant 0 : i32
    %c0_i32_0 = arith.constant 0 : i32
    %c0_i32_1 = arith.constant 0 : i32
    return %c0_i32, %c0_i32_0 : i32, i32
  }
  func.func @transform_7(%arg0: i32, %arg1: i32) -> (i32, i32, i32) {
    %c0_i32 = arith.constant 0 : i32
    %c0_i32_0 = arith.constant 0 : i32
    %c0_i32_1 = arith.constant 0 : i32
    return %arg0, %c0_i32, %c0_i32_0 : i32, i32, i32
  }
}

module attributes {stable_mosaic.version = 11 : i64} {
  func.func @_fused_head_kernel(%arg0: i32, %arg1: i32, %arg2: memref<1x4x256xbf16, #tpu.memory_space<vmem>>, %arg3: memref<4x128xbf16, #tpu.memory_space<vmem>>, %arg4: memref<1x128xf32, #tpu.memory_space<vmem>>, %arg5: memref<128x128xbf16, #tpu.memory_space<vmem>>, %arg6: memref<1x128xf32, #tpu.memory_space<vmem>>, %arg7: memref<128x128xbf16, #tpu.memory_space<vmem>>, %arg8: memref<1x128xf32, #tpu.memory_space<vmem>>, %arg9: memref<1x1x128xf32, #tpu.memory_space<vmem>>, %arg10: memref<1x4xf32, #tpu.memory_space<vmem>>) attributes {dimension_semantics = [#tpu.dimension_semantics<parallel>, #tpu.dimension_semantics<arbitrary>], iteration_bounds = array<i64: 2, 1>, scalar_prefetch = 0 : i64, scratch_operands = 1 : i64, tpu.core_type = #tpu.core_type<tc>, window_params = [{transform_indices = @transform_0, window_bounds = array<i64: 1, 4, 256>}, {pipeline_mode = #tpu.pipeline_mode<synchronous>, transform_indices = @transform_1, window_bounds = array<i64: 4, 128>}, {pipeline_mode = #tpu.pipeline_mode<synchronous>, transform_indices = @transform_2, window_bounds = array<i64: 1, 128>}, {pipeline_mode = #tpu.pipeline_mode<synchronous>, transform_indices = @transform_3, window_bounds = array<i64: 128, 128>}, {pipeline_mode = #tpu.pipeline_mode<synchronous>, transform_indices = @transform_4, window_bounds = array<i64: 1, 128>}, {pipeline_mode = #tpu.pipeline_mode<synchronous>, transform_indices = @transform_5, window_bounds = array<i64: 128, 128>}, {pipeline_mode = #tpu.pipeline_mode<synchronous>, transform_indices = @transform_6, window_bounds = array<i64: 1, 128>}, {transform_indices = @transform_7, window_bounds = array<i64: 1, 1, 128>}]} {
    %c0_i32 = arith.constant 0 : i32
    %0 = arith.cmpi eq, %arg1, %c0_i32 : i32
    %1 = arith.extui %0 : i1 to i32
    %c0_i32_0 = arith.constant 0 : i32
    %2 = arith.cmpi ne, %1, %c0_i32_0 : i32
    scf.if %2 {
      %cst_9 = arith.constant 0.000000e+00 : f32
      %12 = vector.broadcast %cst_9 : f32 to vector<1x4xf32>
      %c0_10 = arith.constant 0 : index
      %c0_11 = arith.constant 0 : index
      %13 = vector.load %arg10[%c0_10, %c0_11] : memref<1x4xf32, #tpu.memory_space<vmem>>, vector<1x4xf32>
      tpu.vector_store %arg10[%c0_10, %c0_11], %12 {strides = array<i32>} : memref<1x4xf32, #tpu.memory_space<vmem>>, vector<1x4xf32>,
    } else {
    }
    %c0 = arith.constant 0 : index
    %c0_1 = arith.constant 0 : index
    %c0_2 = arith.constant 0 : index
    %3 = vector.load %arg2[%c0, %c0_1, %c0_2] : memref<1x4x256xbf16, #tpu.memory_space<vmem>>, vector<1x4x256xbf16>
    %c0_3 = arith.constant 0 : index
    %c0_4 = arith.constant 0 : index
    %4 = vector.load %arg10[%c0_3, %c0_4] : memref<1x4xf32, #tpu.memory_space<vmem>>, vector<1x4xf32>
    %5 = arith.extf %3 : vector<1x4x256xbf16> to vector<1x4x256xf32>
    %cst = arith.constant dense<0.000000e+00> : vector<1x4xf32>
    %6 = vector.multi_reduction <add>, %5, %cst [2] : vector<1x4x256xf32> to vector<1x4xf32>
    %7 = arith.addf %4, %6 : vector<1x4xf32>
    %c0_5 = arith.constant 0 : index
    %c0_6 = arith.constant 0 : index
    %8 = vector.load %arg10[%c0_5, %c0_6] : memref<1x4xf32, #tpu.memory_space<vmem>>, vector<1x4xf32>
    tpu.vector_store %arg10[%c0_5, %c0_6], %7 {strides = array<i32>} : memref<1x4xf32, #tpu.memory_space<vmem>>, vector<1x4xf32>,
    %c0_i32_7 = arith.constant 0 : i32
    %9 = arith.cmpi eq, %arg1, %c0_i32_7 : i32
    %10 = arith.extui %9 : i1 to i32
    %c0_i32_8 = arith.constant 0 : i32
    %11 = arith.cmpi ne, %10, %c0_i32_8 : i32
    scf.if %11 {
      %c0_9 = arith.constant 0 : index
      %c0_10 = arith.constant 0 : index
      %12 = vector.load %arg10[%c0_9, %c0_10] : memref<1x4xf32, #tpu.memory_space<vmem>>, vector<1x4xf32>
      %c0_11 = arith.constant 0 : index
      %c0_12 = arith.constant 0 : index
      %13 = vector.load %arg4[%c0_11, %c0_12] : memref<1x128xf32, #tpu.memory_space<vmem>>, vector<1x128xf32>
      %14 = arith.truncf %12 : vector<1x4xf32> to vector<1x4xbf16>
      %c0_13 = arith.constant 0 : index
      %c0_14 = arith.constant 0 : index
      %15 = vector.load %arg3[%c0_13, %c0_14] : memref<4x128xbf16, #tpu.memory_space<vmem>>, vector<4x128xbf16>
      %cst_15 = arith.constant dense<0.000000e+00> : vector<1x128xf32>
      %16 = tpu.matmul %14, %15, %cst_15 {dimension_numbers = #tpu.dot_dimension_numbers<[1], [0], [0], [1], [0, 0, 1, 1], [], []>} : vector<1x4xbf16>, vector<4x128xbf16>, vector<1x128xf32> -> vector<1x128xf32>
      %17 = arith.addf %16, %13 : vector<1x128xf32>
      %cst_16 = arith.constant 0.000000e+00 : f32
      %18 = vector.broadcast %cst_16 : f32 to vector<1x128xf32>
      %19 = arith.maximumf %17, %18 : vector<1x128xf32>
      %c0_17 = arith.constant 0 : index
      %c0_18 = arith.constant 0 : index
      %20 = vector.load %arg6[%c0_17, %c0_18] : memref<1x128xf32, #tpu.memory_space<vmem>>, vector<1x128xf32>
      %21 = arith.truncf %19 : vector<1x128xf32> to vector<1x128xbf16>
      %c0_19 = arith.constant 0 : index
      %c0_20 = arith.constant 0 : index
      %22 = vector.load %arg5[%c0_19, %c0_20] : memref<128x128xbf16, #tpu.memory_space<vmem>>, vector<128x128xbf16>
      %cst_21 = arith.constant dense<0.000000e+00> : vector<1x128xf32>
      %23 = tpu.matmul %21, %22, %cst_21 {dimension_numbers = #tpu.dot_dimension_numbers<[1], [0], [0], [1], [0, 0, 1, 1], [], []>} : vector<1x128xbf16>, vector<128x128xbf16>, vector<1x128xf32> -> vector<1x128xf32>
      %24 = arith.addf %23, %20 : vector<1x128xf32>
      %cst_22 = arith.constant 0.000000e+00 : f32
      %25 = vector.broadcast %cst_22 : f32 to vector<1x128xf32>
      %26 = arith.maximumf %24, %25 : vector<1x128xf32>
      %c0_23 = arith.constant 0 : index
      %c0_24 = arith.constant 0 : index
      %27 = vector.load %arg8[%c0_23, %c0_24] : memref<1x128xf32, #tpu.memory_space<vmem>>, vector<1x128xf32>
      %28 = arith.truncf %26 : vector<1x128xf32> to vector<1x128xbf16>
      %c0_25 = arith.constant 0 : index
      %c0_26 = arith.constant 0 : index
      %29 = vector.load %arg7[%c0_25, %c0_26] : memref<128x128xbf16, #tpu.memory_space<vmem>>, vector<128x128xbf16>
      %cst_27 = arith.constant dense<0.000000e+00> : vector<1x128xf32>
      %30 = tpu.matmul %28, %29, %cst_27 {dimension_numbers = #tpu.dot_dimension_numbers<[1], [0], [0], [1], [0, 0, 1, 1], [], []>} : vector<1x128xbf16>, vector<128x128xbf16>, vector<1x128xf32> -> vector<1x128xf32>
      %31 = arith.addf %30, %27 : vector<1x128xf32>
      %32 = vector.shape_cast %31 : vector<1x128xf32> to vector<1x1x128xf32>
      %c0_28 = arith.constant 0 : index
      %c0_29 = arith.constant 0 : index
      %c0_30 = arith.constant 0 : index
      %33 = vector.load %arg9[%c0_28, %c0_29, %c0_30] : memref<1x1x128xf32, #tpu.memory_space<vmem>>, vector<1x1x128xf32>
      tpu.vector_store %arg9[%c0_28, %c0_29, %c0_30], %32 {strides = array<i32>} : memref<1x1x128xf32, #tpu.memory_space<vmem>>, vector<1x1x128xf32>,
    } else {
    }
    return
  }
  func.func @transform_0(%arg0: i32, %arg1: i32) -> (i32, i32, i32) {
    %c0_i32 = arith.constant 0 : i32
    %c0_i32_0 = arith.constant 0 : i32
    return %arg0, %c0_i32, %arg1 : i32, i32, i32
  }
  func.func @transform_1(%arg0: i32, %arg1: i32) -> (i32, i32) {
    %c0_i32 = arith.constant 0 : i32
    %c0_i32_0 = arith.constant 0 : i32
    %c0_i32_1 = arith.constant 0 : i32
    return %c0_i32, %c0_i32_0 : i32, i32
  }
  func.func @transform_2(%arg0: i32, %arg1: i32) -> (i32, i32) {
    %c0_i32 = arith.constant 0 : i32
    %c0_i32_0 = arith.constant 0 : i32
    %c0_i32_1 = arith.constant 0 : i32
    return %c0_i32, %c0_i32_0 : i32, i32
  }
  func.func @transform_3(%arg0: i32, %arg1: i32) -> (i32, i32) {
    %c0_i32 = arith.constant 0 : i32
    %c0_i32_0 = arith.constant 0 : i32
    %c0_i32_1 = arith.constant 0 : i32
    return %c0_i32, %c0_i32_0 : i32, i32
  }
  func.func @transform_4(%arg0: i32, %arg1: i32) -> (i32, i32) {
    %c0_i32 = arith.constant 0 : i32
    %c0_i32_0 = arith.constant 0 : i32
    %c0_i32_1 = arith.constant 0 : i32
    return %c0_i32, %c0_i32_0 : i32, i32
  }
  func.func @transform_5(%arg0: i32, %arg1: i32) -> (i32, i32) {
    %c0_i32 = arith.constant 0 : i32
    %c0_i32_0 = arith.constant 0 : i32
    %c0_i32_1 = arith.constant 0 : i32
    return %c0_i32, %c0_i32_0 : i32, i32
  }
  func.func @transform_6(%arg0: i32, %arg1: i32) -> (i32, i32) {
    %c0_i32 = arith.constant 0 : i32
    %c0_i32_0 = arith.constant 0 : i32
    %c0_i32_1 = arith.constant 0 : i32
    return %c0_i32, %c0_i32_0 : i32, i32
  }
  func.func @transform_7(%arg0: i32, %arg1: i32) -> (i32, i32, i32) {
    %c0_i32 = arith.constant 0 : i32
    %c0_i32_0 = arith.constant 0 : i32
    %c0_i32_1 = arith.constant 0 : i32
    return %arg0, %c0_i32, %c0_i32_0 : i32, i32, i32
  }
}

</mosaic_0001>

<bundles_post_ra>
// kernel: tpu_custom_call.1
= control target key start
LH: loop header
LB: loop body
LE: loop exit
PB: predicated region body
PF: predicated region fallthrough
CT: control target
= control target key end

     0   :  { %12 = vsyncpa [#allocation4], 0  ;;  %s1525_s0 = inlined_call_operand.hbm [shape: bf16[2,4,256], index: 0, kind: input, shape index: {}]   ;;  %s1526_s1 = inlined_call_operand.vmem [shape: bf16[4,128], index: 1, kind: input, shape index: {}]   ;;  %s1527_s2 = inlined_call_operand.vmem [shape: f32[1,128], index: 2, kind: input, shape index: {}]   ;;  %s1528_s3 = inlined_call_operand.hbm [shape: bf16[128,128], index: 3, kind: input, shape index: {}]   ;;  %s1529_s4 = inlined_call_operand.vmem [shape: f32[1,128], index: 4, kind: input, shape index: {}]   ;;  %s1530_s5 = inlined_call_operand.hbm [shape: bf16[128,128], index: 5, kind: input, shape index: {}]   ;;  %s1531_s6 = inlined_call_operand.vmem [shape: f32[1,128], index: 6, kind: input, shape index: {}]   ;;  %s1532_s7 = inlined_call_operand.hbm [shape: f32[2,1,128], index: 7, kind: output, shape index: {}]  }
   0x1   :  { %14 = vsyncpa [#allocation4 + $0x1], 0 }
   0x2   :  { %15 = vsyncpa [#allocation7], 0 }
   0x3   :  { %16 = vsyncpa [#allocation5], 0 }
   0x4   :  { %18 = vsyncpa [#allocation5 + $0x1], 0  ;;  %s1236_s24 = smov 0   ;;  %s1238_s25 = smov 0  }
   0x5   :  { %s1240_s26 = smov 0   ;;  %s1242_s27 = smov 0  }
   0x6   :  { %s1244_s28 = smov 0   ;;  %s1246_s29 = smov 0  }
   0x7 LB: > { %1539 = sst [smem:[#allocation13_spill]] %s1164_s24  ;;  %s806_s30 = sadd.s32 4294967295, %s1184_s29   ;;  %s1184_s29 = sphi %s1246_s29, %s24_s29   ;;  %s1180_s28 = sphi %s1244_s28, %s1560_s28   ;;  %s1176_s27 = sphi %s1242_s27, %s1559_s27   ;;  %s1172_s26 = sphi %s1240_s26, %s1558_s26   ;;  %s1168_s25 = sphi %s1238_s25, %s1557_s25   ;;  %s1164_s24 = sphi %s1236_s24, %s1556_s24  }
   0x8   : > { %s807_s8 = sadd.s32 4294967294, %s1184_s29   ;;  %p58_p0 = scmp.ne.s32.totalorder %s1168_s25, %s1164_s24 }
   0x9   : > { %p1270_p1 = scmp.eq.s32.totalorder %s806_s30, 0  ;;  %p1274_p2 = scmp.eq.s32.totalorder %s806_s30, 1 }
   0xa   : > { %p214_p3 = scmp.eq.s32.totalorder %s807_s8, 1  ;;  %p808_p5 = scmp.ge.s32.totalorder %s1184_s29, 1 }
   0xb   : > { %s1540_s9 = scalar_select %p1270_p1, 1, 0 }
   0xc   : > { %p1280_p4 = por %p1270_p1, %p58_p0  ;;  %p1285_p6 = por %p214_p3, %p58_p0 }
   0xd   : > { %p221_p7 = scmp.lt.s32.totalorder %s1184_s29, 3  ;;  %s1186_s14 = smov [#allocation6]  }
   0xe   : > { %s1542_s11 = scalar_select %p1280_p4, 1, 0 }
   0xf   : > { %s1543_s12 = scalar_select %p1285_p6, 1, 0 }
  0x10   : > { %p1290_p8 = pnand %p808_p5, %p221_p7  ;;  %s239_s15 = sshll.u32 %s1186_s14, 4  ;;  %s1294_s15 = int_to_ptr.vmem [resolvable:$true] %s239_s15 }
  0x11   : > { %1544 = sst [smem:[#allocation14_spill]] %s1543_s12  ;;  %s1187_s17 = smov [#allocation8]  }
  0x12   : > { %p918_p9 = pneg %p1290_p8  ;;  %s255_s18 = sshll.u32 %s1187_s17, 4  ;;  %s1305_s18 = int_to_ptr.vmem [resolvable:$true] %s255_s18 }
  0x13   : > { %s1012_s21 = scalar_lea.hbm %s1528_s3, 1024 }
  0x14   : > { %p1301_p11 = pnand %p918_p9, %p1270_p1  ;;  %p1013_p12 = scmp.ne.s32.totalorder %s1528_s3, %s1012_s21 }
  0x15   : > { %p1019_p5 = scmp.lt.u32.totalorder %s1012_s21, %s1528_s3 }
  0x16   : > { %p1014_p13 = pneg %p1301_p11 }
  0x18   : > { %p1015_p0 = pnand %p1014_p13, %p1013_p12 }
  0x1a   : > { %p1016_p3 = pneg %p1015_p0 }
  0x1c   : > { %p1021_p7 = pnand %p1019_p5, %p1016_p3 }
  0x1e   : > { %1024 = shalt.err (!%p1021_p7)
}
  0x1f   : > { %s1025_s14 = scalar_lea.vmem %s1294_s15, 1024  ;;  %p1033_p1 = scmp.lt.s32.totalorder %s1294_s15, %s1294_s15 }
  0x20   : > { %p1026_p9 = scmp.ne.s32.totalorder %s1294_s15, %s1025_s14  ;;  %p1034_p12 = scmp.lt.s32.totalorder %s1025_s14, %s1025_s14 }
  0x22   : > { %p1028_p10 = pnand %p1026_p9, %p1014_p13  ;;  %p1035_p0 = por %p1034_p12, %p1033_p1 }
  0x24   : > { %p1029_p6 = pneg %p1028_p10 }
  0x26   : > { %p1036_p4 = pnand %p1035_p0, %p1029_p6 }
  0x28   : > { %1039 = shalt.err (!%p1036_p4)
}
  0x29   : > { %s1188_s17 = smov 64   ;;  %s1189_s19 = smov 4  }
  0x2a   : > { %921 = dma.hbm_to_vmem [thread:$0]  (!%p1301_p11), %s1528_s3, 1024, %s1294_s15, [#allocation7], %s1188_s17, %s1188_s17, %s1189_s19  }
  0x2b   : > { %s1040_s30 = scalar_lea.hbm %s1530_s5, 1024 }
  0x2c   : > { %p1041_p1 = scmp.ne.s32.totalorder %s1530_s5, %s1040_s30  ;;  %p1047_p10 = scmp.lt.u32.totalorder %s1040_s30, %s1530_s5 }
  0x2e   : > { %p1043_p4 = pnand %p1041_p1, %p1014_p13 }
  0x30   : > { %p1044_p6 = pneg %p1043_p4 }
  0x32   : > { %p1049_p3 = pnand %p1047_p10, %p1044_p6 }
  0x34   : > { %1052 = shalt.err (!%p1049_p3)
}
  0x35   : > { %s1053_s15 = scalar_lea.vmem %s1305_s18, 1024  ;;  %p1061_p12 = scmp.lt.s32.totalorder %s1305_s18, %s1305_s18 }
  0x36   : > { %p1054_p5 = scmp.ne.s32.totalorder %s1305_s18, %s1053_s15  ;;  %p1062_p0 = scmp.lt.s32.totalorder %s1053_s15, %s1053_s15 }
  0x38   : > { %p1056_p7 = pnand %p1054_p5, %p1014_p13  ;;  %p1063_p1 = por %p1062_p0, %p1061_p12 }
  0x3a   : > { %p1057_p9 = pneg %p1056_p7 }
  0x3c   : > { %p1064_p4 = pnand %p1063_p1, %p1057_p9 }
  0x3e   : > { %1067 = shalt.err (!%p1064_p4)
}
  0x3f   : > { %924 = dma.hbm_to_vmem [thread:$0]  (!%p1301_p11), %s1530_s5, 1024, %s1305_s18, [#allocation7], %s1188_s17, %s1188_s17, %s1189_s19  }
  0x40   : > { %s36_s20 = sadd.s32 1, %s1180_s28  ;;  %s45_s21 = sadd.s32 1, %s1172_s26 }
  0x41   : > { %p38_p13 = scmp.ge.s32.totalorder %s36_s20, 2  ;;  %p52_p6 = scmp.ne.s32.totalorder %s1172_s26, %s1168_s25 }
  0x42   : > { %p53_p10 = scmp.eq.s32.totalorder %s1184_s29, 0  ;;  %p935_p3 = scmp.lt.s32.totalorder %s1184_s29, 2 }
  0x43   : > { %s1562_s20 = smov (%p38_p13, %s36_s20), 0  ;;  %p1369_p7 = por %p1274_p2, %p52_p6 }
  0x44   : > { %p54_p5 = por %p53_p10, %p52_p6  ;;  %s40_s22 = ssub.s32 %s1180_s28, %s1562_s20 }
  0x45   : > { %s1547_s16 = scalar_select %p1369_p7, 1, 0 }
  0x46   : > { %s272_s23 = sand.u32 1, %s1172_s26   ;;  %p43_p9 = scmp.eq.s32.totalorder %s40_s22, 0 }
  0x47   : > { %s812_s18 = sshll.u32 %s272_s23, 2  ;;  %s839_s17 = sshll.u32 %s1180_s28, 6 }
  0x48   : > { %s1378_s19 = scalar_select %p43_p9, %s1172_s26, %s45_s21  }
  0x49   : > { %s1383_s14 = scalar_lea.hbm %s1525_s0, %s839_s17  ;;  %s276_s10 = scalar_lea.vmem [#allocation3], %s812_s18 }
  0x4a   : > { %s286_s15 = sshll.u32 %s276_s10, 4  ;;  %p1387_p2 = pnand %p935_p3, %p54_p5  ;;  %s1391_s15 = int_to_ptr.vmem [resolvable:$true] %s286_s15 }
  0x4b   : > { %s273_s12 = scalar_lea.sflag [#allocation4], %s272_s23  ;;  %s1068_s21 = scalar_lea.hbm %s1383_s14, 64 }
  0x4c   : > { %p1069_p11 = scmp.ne.s32.totalorder %s1383_s14, %s1068_s21  ;;  %p1070_p12 = pneg %p1387_p2 }
  0x4d   : > { %s1073_s17 = scalar_lea.hbm %s1525_s0, 128  ;;  %p1074_p4 = scmp.lt.u32.totalorder %s1383_s14, %s1525_s0 }
  0x4e   : > { %p1071_p0 = pnand %p1070_p12, %p1069_p11  ;;  %p1075_p13 = scmp.lt.u32.totalorder %s1073_s17, %s1068_s21 }
  0x4f   : > { %p1077_p10 = scmp.lt.u32.totalorder %s1068_s21, %s1383_s14 }
  0x50   : > { %p1072_p1 = pneg %p1071_p0  ;;  %p1076_p6 = por %p1075_p13, %p1074_p4 }
  0x52   : > { %p1078_p3 = por %p1077_p10, %p1076_p6 }
  0x54   : > { %p1079_p5 = pnand %p1078_p3, %p1072_p1 }
  0x56   : > { %1082 = shalt.err (!%p1079_p5)
}
  0x57   : > { %s1083_s23 = scalar_lea.vmem %s1391_s15, 64  ;;  %s1190_s10 = smov [#allocation3]  }
  0x58   : > { %p1084_p9 = scmp.ne.s32.totalorder %s1391_s15, %s1083_s23  ;;  %s1088_s22 = sshll.u32 %s1190_s10, 4  ;;  %s1089_s22 = int_to_ptr.vmem [resolvable:$false] %s1088_s22 }
  0x59   : > { %s1090_s18 = scalar_lea.vmem %s1089_s22, 128  ;;  %p1091_p7 = scmp.lt.s32.totalorder %s1391_s15, %s1089_s22 }
  0x5a   : > { %p1086_p11 = pnand %p1084_p9, %p1070_p12  ;;  %p1092_p4 = scmp.lt.s32.totalorder %s1090_s18, %s1083_s23 }
  0x5c   : > { %p1087_p0 = pneg %p1086_p11  ;;  %p1093_p13 = por %p1092_p4, %p1091_p7 }
  0x5e   : > { %p1094_p6 = pnand %p1093_p13, %p1087_p0 }
  0x60   : > { %1097 = shalt.err (!%p1094_p6)
}
  0x61   : > { %928 = dma.hbm_to_vmem [thread:$0]  (!%p1387_p2), %s1383_s14, 64, %s1391_s15, %s273_s12  }
  0x62   : > { %295 = sbr.rel (%p1290_p8) target bundleno = 1079 (0x437), region = 48  ;;  %s1421_s21 = sand.u32 (!%p1290_p8), 1, %s1168_s25  }
  0x63   : > { %s816_s17 = sshll.u32 (!%p1290_p8), %s1421_s21, 2  ;;  %s298_s30 = scalar_lea.sflag (!%p1290_p8), [#allocation4], %s1421_s21 }
  0x64   : > { %s301_s8 = scalar_lea.vmem (!%p1290_p8), [#allocation3], %s816_s17  ;;  %p1549_p7 = scmp.ne.s32.totalorder (!%p1290_p8), %s1542_s11, 0 }
  0x69   : > { %1151 = dma.done.wait (%p1549_p7), %s298_s30, 64  }
  0x6a   : > { %1153 = vsyncadd (%p1549_p7), %s298_s30, 4294967232  ;;  %p1550_p12 = scmp.ne.s32.totalorder %s1540_s9, 0 }
  0x6c   : > { %1155 = dma.done.wait (%p1550_p12), [#allocation7], 2048  }
  0x6d   : > { %1157 = vsyncadd (%p1550_p12), [#allocation7], 4294965248  ;;  %vm353_vm0 = vcmask 1043456   ;;  %v347_v0 = vld [vmem:[%s301_s8] sm:$0xf]  ;;  %v1191_v6 = vmov 0   ;;  %v360_v7 = vlaneseq }
  0x6e   : > { %v349_v1 = vunpack.c.l.bf16 %v347_v0  ;;  %995 = vset.pattern.permute.xlu0 %v1191_v6  ;;  %vm345_vm1 = vcmask 24576   ;;  %v1192_v10 = vmov 0.0   ;;  %v1193_v12 = vmov 1966171168   ;;  %v433_v31 = vld [vmem:[%s1526_s1] sm:$0x3] }
  0x6f   : > { %v361_v8 = vshrl.u32 %v360_v7, 7  ;;  %v404_v9 = vand.u32 127, %v360_v7  ;;  %346 = vst.msk [vmem:[#allocation2] sm:$0x1] %vm345_vm1, %v1192_v10  ;;  %860 = vmatprep.subr.bf16.mxu0 %v1192_v10  ;;  %866 = vmatprep.subr.bf16.mxu1 %v1192_v10  ;;  %v379_v13 = vunpack.c.l.s4 %v1193_v12  ;;  %vm438_vm2 = vcmask 1041408   ;;  %v996_v33 = vld [vmem:[#allocation6] sm:$0xff]  }
  0x70   : > { %v351_v2 = vcombine.high %v349_v1, %v349_v1  ;;  %v354_v3 = vsel %vm353_vm0, %v349_v1, 0.0  ;;  %v440_v32 = vsel %vm438_vm2, %v433_v31, 0  ;;  %vm1194_vm3 = vmmov 0   ;;  %867 = vmatpush3.bf16.msra.mxu1 %v996_v33  ;;  %v997_v34 = vld [vmem:[#allocation6 + $0x8] sm:$0xff]   ;;  %v998_v35 = vld [vmem:[#allocation6 + $0x10] sm:$0xff]   ;;  %v999_v36 = vld [vmem:[#allocation6 + $0x18] sm:$0xff]  }
  0x71   : > { %v407_v11 = vsub.s32 %v404_v9, %v361_v8  ;;  %v380_v14 = vunpack.c.0.s8 %v379_v13  ;;  %v362_v15 = vsub.s32 0, %v361_v8  ;;  %v366_v16 = vsub.s32 1, %v361_v8  ;;  %862 = vmatprep.mubr.msk.bf16.mxu0 %vm1194_vm3, %v1192_v10  ;;  %882 = vmatprep.mubr.msk.bf16.mxu1 %vm1194_vm3, %v1192_v10  ;;  %v1000_v37 = vld [vmem:[#allocation6 + $0x20] sm:$0xff]   ;;  %v1001_v38 = vld [vmem:[#allocation6 + $0x28] sm:$0xff]   ;;  %v1002_v47 = vld [vmem:[#allocation6 + $0x30] sm:$0xff]   ;;  %s836_s10 = sshll.u32 %s1176_s27, 4 }
  0x72   : > { %v355_v4 = vsel %vm353_vm0, %v351_v2, 0.0  ;;  %v370_v17 = vsub.s32 2, %v361_v8  ;;  %v374_v18 = vsub.s32 3, %v361_v8  ;;  %861 = vmatpush3.bf16.msra.mxu0 %v440_v32  ;;  %868 = vmatprep.subr.bf16.mxu1 %v1192_v10  ;;  %vm434_vm4 = vcmask 31744   ;;  %v1003_v48 = vld [vmem:[#allocation6 + $0x38] sm:$0xff]   ;;  %v1004_v49 = vld [vmem:[#allocation8] sm:$0xff]   ;;  %s1476_s8 = scalar_lea.hbm %s1532_s7, %s836_s10 }
  0x73   : > { %v356_v5 = vadd.f32 %v355_v4, %v354_v3  ;;  %v383_v20 = vsub.s32 %v380_v14, %v361_v8  ;;  %886 = vmatprep.subr.bf16.mxu0 %v1192_v10  ;;  %v1005_v50 = vld [vmem:[#allocation8 + $0x8] sm:$0xff]   ;;  %v1006_v51 = vld [vmem:[#allocation8 + $0x10] sm:$0xff]   ;;  %v1007_v52 = vld [vmem:[#allocation8 + $0x18] sm:$0xff]   ;;  %s338_s22 = scalar_lea.vmem [#allocation9], %s1421_s21  ;;  %s698_s9 = scalar_lea.sflag [#allocation5], %s1421_s21 }
  0x74   : > { %869 = vmatpush3.bf16.msra.mxu1 %v997_v34  ;;  %v1008_v53 = vld [vmem:[#allocation8 + $0x20] sm:$0xff]   ;;  %v1009_v54 = vld [vmem:[#allocation8 + $0x28] sm:$0xff]   ;;  %v431_v55 = vld [vmem:[%s1527_s2] sm:$0x1]  ;;  %s710_s18 = sshll.u32 %s338_s22, 4  ;;  %p1551_p2 = scmp.ne.s32.totalorder %s1547_s16, 0  ;;  %s1478_s18 = int_to_ptr.vmem [resolvable:$true] %s710_s18 }
  0x75   : > { %357 = vadd.xlane.f32.xlu0 %v356_v5  ;;  %870 = vmatprep.subr.bf16.mxu1 %v1192_v10  ;;  %v1010_v63 = vld [vmem:[#allocation8 + $0x30] sm:$0xff]   ;;  %v1011_v0 = vld [vmem:[#allocation8 + $0x38] sm:$0xff]   ;;  %s1098_s27 = scalar_lea.vmem %s1478_s18, 16  ;;  %s1195_s11 = smov [#allocation9]  }
  0x76   : > { %v348_v42 = vld [vmem:[#allocation2] sm:$0x1]  ;;  %p1099_p8 = scmp.ne.s32.totalorder %s1478_s18, %s1098_s27  ;;  %s1102_s13 = sshll.u32 %s1195_s11, 4  ;;  %s1103_s13 = int_to_ptr.vmem [resolvable:$false] %s1102_s13 }
  0x77   : > { %v483_v1 = vld [vmem:[%s1529_s4] sm:$0x1]  ;;  %s1104_s14 = scalar_lea.vmem %s1103_s13, 32  ;;  %p1105_p3 = scmp.lt.s32.totalorder %s1478_s18, %s1103_s13 }
  0x78   : > { %871 = vmatpush3.bf16.msra.mxu1 %v998_v35  ;;  %v590_v9 = vld [vmem:[%s1531_s6] sm:$0x1]  ;;  %p1100_p1 = pnand %p1099_p8, %p1551_p2  ;;  %p1106_p5 = scmp.lt.s32.totalorder %s1104_s14, %s1098_s27 }
  0x79   : > { %872 = vmatprep.subr.bf16.mxu1 %v1192_v10 }
  0x7a   : > { %p1101_p10 = pneg %p1100_p1  ;;  %p1107_p9 = por %p1106_p5, %p1105_p3 }
  0x7c   : > { %873 = vmatpush3.bf16.msra.mxu1 %v999_v36  ;;  %p1108_p11 = pnand %p1107_p9, %p1101_p10 }
  0x7d   : > { %874 = vmatprep.subr.bf16.mxu1 %v1192_v10 }
  0x80   : > { %875 = vmatpush3.bf16.msra.mxu1 %v1000_v37 }
  0x81   : > { %876 = vmatprep.subr.bf16.mxu1 %v1192_v10 }
  0x84   : > { %877 = vmatpush3.bf16.msra.mxu1 %v1001_v38 }
  0x85   : > { %878 = vmatprep.subr.bf16.mxu1 %v1192_v10 }
  0x88   : > { %879 = vmatpush3.bf16.msra.mxu1 %v1002_v47 }
  0x89   : > { %880 = vmatprep.subr.bf16.mxu1 %v1192_v10 }
  0x8c   : > { %881 = vmatpush3.bf16.msra.mxu1 %v1003_v48 }
 0x102   : > { %v358_v19 = vpop.xlane.xlu0 %357 }
 0x103   : > { %v363_v21 = vrot.slane %v358_v19, %v362_v15  ;;  %v367_v22 = vrot.slane %v358_v19, %v366_v16  ;;  %v371_v23 = vrot.slane %v358_v19, %v370_v17  ;;  %v375_v24 = vrot.slane %v358_v19, %v374_v18 }
 0x105   : > { %v376_v25 = vcombine.low %v363_v21, %v367_v22  ;;  %v377_v26 = vcombine.low %v371_v23, %v375_v24 }
 0x107   : > { %v384_v27 = vrot.slane %v376_v25, %v383_v20  ;;  %v391_v28 = vrot.slane %v377_v26, %v383_v20 }
 0x109   : > { %v392_v29 = vcombine.low %v384_v27, %v391_v28 }
 0x10b   : > { %v399_v30 = vrot.slane %v392_v29, %v383_v20 }
 0x10d   : > { %401 = vperm.xlu0 %995, %v399_v30  }
 0x18c   : > { %v402_v39 = vpop.permute.xlu0 %401 }
 0x18d   : > { %v408_v40 = vrot.slane %v402_v39, %v407_v11 }
 0x18f   : > { %v415_v41 = vrot.slane %v408_v40, %v383_v20 }
 0x191   : > { %v422_v43 = vrot.slane %v415_v41, %v383_v20 }
 0x193   : > { %v424_v44 = vadd.f32 %v422_v43, %v348_v42 }
 0x195   : > { %426 = vst.msk [vmem:[#allocation2] sm:$0x1] %vm345_vm1, %v424_v44 }
 0x19c   : > { %v430_v45 = vld [vmem:[#allocation2] sm:$0x1] }
 0x19d   : > { %v432_v46 = vpack.c.bf16 %v430_v45, %v430_v45 }
 0x19f   : > { %863 = vmatmul.mubr.msk.bf16.vlgmr.msra.gmra.mrb[0].mxu0 %vm434_vm4, %v432_v46 }
 0x1a0   : > { %902 = vmatprep.mubr.msk.bf16.mxu0 %vm1194_vm3, %v1192_v10  ;;  %887 = vmatpush3.bf16.msra.mxu0 %v1004_v49 }
 0x1a1   : > { %888 = vmatprep.subr.bf16.mxu0 %v1192_v10 }
 0x1a4   : > { %889 = vmatpush3.bf16.msra.mxu0 %v1005_v50 }
 0x1a5   : > { %890 = vmatprep.subr.bf16.mxu0 %v1192_v10 }
 0x1a8   : > { %891 = vmatpush3.bf16.msra.mxu0 %v1006_v51 }
 0x1a9   : > { %892 = vmatprep.subr.bf16.mxu0 %v1192_v10 }
 0x1ac   : > { %893 = vmatpush3.bf16.msra.mxu0 %v1007_v52 }
 0x1ad   : > { %894 = vmatprep.subr.bf16.mxu0 %v1192_v10 }
 0x1b0   : > { %895 = vmatpush3.bf16.msra.mxu0 %v1008_v53 }
 0x1b1   : > { %896 = vmatprep.subr.bf16.mxu0 %v1192_v10 }
 0x1b4   : > { %897 = vmatpush3.bf16.msra.mxu0 %v1009_v54 }
 0x1b5   : > { %898 = vmatprep.subr.bf16.mxu0 %v1192_v10 }
 0x1b8   : > { %899 = vmatpush3.bf16.msra.mxu0 %v1010_v63 }
 0x1b9   : > { %900 = vmatprep.subr.bf16.mxu0 %v1192_v10 }
 0x1bc   : > { %901 = vmatpush3.bf16.msra.mxu0 %v1011_v0 }
 0x272   : > { %v476_v56 = vpop.f32.mrb[0].mxu0 }
 0x273   : > { %v477_v57 = vadd.f32 %v476_v56, %v431_v55  ;;  %v864_v58 = vpop.f32.mrb[1].mxu0 }
 0x274   : > { %v479_v59 = vpop.f32.mrb[2].mxu0 }
 0x275   : > { %v482_v60 = vmax.f32 %v477_v57, 0.0  ;;  %v865_v61 = vpop.f32.mrb[3].mxu0 }
 0x277   : > { %v484_v62 = vpack.c.bf16 %v482_v60, %v482_v60 }
 0x279   : > { %883 = vmatmul.mubr.bf16.vlgmr.msra.gmra.mrb[0].mxu1 %v484_v62 }
 0x34c   : > { %v583_v2 = vpop.f32.mrb[0].mxu1 }
 0x34d   : > { %v584_v3 = vadd.f32 %v583_v2, %v483_v1  ;;  %v884_v4 = vpop.f32.mrb[1].mxu1 }
 0x34e   : > { %v586_v5 = vpop.f32.mrb[2].mxu1 }
 0x34f   : > { %v589_v6 = vmax.f32 %v584_v3, 0.0  ;;  %v885_v7 = vpop.f32.mrb[3].mxu1 }
 0x351   : > { %v591_v8 = vpack.c.bf16 %v589_v6, %v589_v6 }
 0x353   : > { %903 = vmatmul.mubr.bf16.vlgmr.msra.gmra.mrb[4].mxu0 %v591_v8 }
 0x426   : > { %v690_v10 = vpop.f32.mrb[4].mxu0 }
 0x427   : > { %v691_v11 = vadd.f32 %v690_v10, %v590_v9  ;;  %v904_v12 = vpop.f32.mrb[5].mxu0 }
 0x428   : > { %v693_v13 = vpop.f32.mrb[6].mxu0 }
 0x429   : > { %696 = vst [vmem:[%s338_s22] sm:$0x1] %v691_v11  ;;  %v905_v14 = vpop.f32.mrb[7].mxu0 }
 0x42a   : > { %1111 = shalt.err (!%p1108_p11)
}
 0x42b   : > { %s1112_s21 = scalar_lea.hbm %s1476_s8, 16  ;;  %s1116_s12 = scalar_lea.hbm %s1532_s7, 32 }
 0x42c   : > { %p1113_p0 = scmp.ne.s32.totalorder %s1476_s8, %s1112_s21  ;;  %p1117_p6 = scmp.lt.u32.totalorder %s1476_s8, %s1532_s7 }
 0x42d   : > { %p1118_p7 = scmp.lt.u32.totalorder %s1116_s12, %s1112_s21  ;;  %p1120_p8 = scmp.lt.u32.totalorder %s1112_s21, %s1476_s8 }
 0x42e   : > { %p1114_p4 = pnand %p1113_p0, %p1551_p2 }
 0x42f   : > { %p1119_p12 = por %p1118_p7, %p1117_p6 }
 0x430   : > { %p1115_p13 = pneg %p1114_p4 }
 0x431   : > { %p1121_p1 = por %p1120_p8, %p1119_p12 }
 0x433   : > { %p1122_p10 = pnand %p1121_p1, %p1115_p13 }
 0x435   : > { %1125 = shalt.err (!%p1122_p10)
}
 0x436   : > { %916 = dma.vmem_to_hbm [thread:$0]  (%p1551_p2), %s1478_s18, 16, %s1476_s8, %s698_s9  }
 0x437 PF: > { %s1552_s22 = sld [smem:[#allocation13_spill]]  ;;  %s1553_s17 = sld [smem:[#allocation14_spill]] }
 0x438   : > { %p1555_p5 = scmp.ge.s32.totalorder %s1184_s29, 2 }
 0x43d   : > { %s722_s30 = sand.u32 1, %s1552_s22   ;;  %p1554_p3 = scmp.ne.s32.totalorder %s1553_s17, 0 }
 0x43e   : > { %s723_s27 = scalar_lea.sflag [#allocation5], %s722_s30 }
 0x43f   : > { %p930_p9 = pnand %p1555_p5, %p1554_p3 }
 0x441   : > { %1159 = dma.done.wait (!%p930_p9), %s723_s27, 16  }
 0x442   : > { %1161 = vsyncadd (!%p930_p9), %s723_s27, 4294967280  ;;  %s24_s29 = sadd.s32 1, %s1184_s29   ;;  %s1556_s24 = smov %s1168_s25 }
 0x443   : > { %p21_p11 = scmp.ge.s32.totalorder %s24_s29, 4   ;;  %s1557_s25 = smov %s1172_s26 }
 0x444   : > { %s1558_s26 = smov %s1378_s19  ;;  %s1559_s27 = smov %s1180_s28 }
 0x445   : > { %s1560_s28 = smov %s1562_s20  ;;  %23 = sbr.rel (!%p21_p11) target bundleno = 7 (0x7), region = 109 }
 0x44c   :  { %727 = vsyncpa [#allocation4], 1 }
 0x44d   :  { %729 = vsyncpa [#allocation4 + $0x1], 1 }
 0x44e   :  { %730 = vsyncpa [#allocation7], 1 }
 0x44f   :  { %731 = vsyncpa [#allocation5], 1 }
 0x450   :  { %733 = vsyncpa [#allocation5 + $0x1], 1 }

// kernel: tpu_custom_call.1
= control target key start
LH: loop header
LB: loop body
LE: loop exit
PB: predicated region body
PF: predicated region fallthrough
CT: control target
= control target key end

     0   :  { %12 = vsyncpa [#allocation4], 0  ;;  %s1525_s0 = inlined_call_operand.hbm [shape: bf16[2,4,256], index: 0, kind: input, shape index: {}]   ;;  %s1526_s1 = inlined_call_operand.vmem [shape: bf16[4,128], index: 1, kind: input, shape index: {}]   ;;  %s1527_s2 = inlined_call_operand.vmem [shape: f32[1,128], index: 2, kind: input, shape index: {}]   ;;  %s1528_s3 = inlined_call_operand.hbm [shape: bf16[128,128], index: 3, kind: input, shape index: {}]   ;;  %s1529_s4 = inlined_call_operand.vmem [shape: f32[1,128], index: 4, kind: input, shape index: {}]   ;;  %s1530_s5 = inlined_call_operand.hbm [shape: bf16[128,128], index: 5, kind: input, shape index: {}]   ;;  %s1531_s6 = inlined_call_operand.vmem [shape: f32[1,128], index: 6, kind: input, shape index: {}]   ;;  %s1532_s7 = inlined_call_operand.hbm [shape: f32[2,1,128], index: 7, kind: output, shape index: {}]  }
   0x1   :  { %14 = vsyncpa [#allocation4 + $0x1], 0 }
   0x2   :  { %15 = vsyncpa [#allocation7], 0 }
   0x3   :  { %16 = vsyncpa [#allocation5], 0 }
   0x4   :  { %18 = vsyncpa [#allocation5 + $0x1], 0  ;;  %s1236_s24 = smov 0   ;;  %s1238_s25 = smov 0  }
   0x5   :  { %s1240_s26 = smov 0   ;;  %s1242_s27 = smov 0  }
   0x6   :  { %s1244_s28 = smov 0   ;;  %s1246_s29 = smov 0  }
   0x7 LB: > { %1539 = sst [smem:[#allocation13_spill]] %s1164_s24  ;;  %s806_s30 = sadd.s32 4294967295, %s1184_s29   ;;  %s1184_s29 = sphi %s1246_s29, %s24_s29   ;;  %s1180_s28 = sphi %s1244_s28, %s1560_s28   ;;  %s1176_s27 = sphi %s1242_s27, %s1559_s27   ;;  %s1172_s26 = sphi %s1240_s26, %s1558_s26   ;;  %s1168_s25 = sphi %s1238_s25, %s1557_s25   ;;  %s1164_s24 = sphi %s1236_s24, %s1556_s24  }
   0x8   : > { %s807_s8 = sadd.s32 4294967294, %s1184_s29   ;;  %p58_p0 = scmp.ne.s32.totalorder %s1168_s25, %s1164_s24 }
   0x9   : > { %p1270_p1 = scmp.eq.s32.totalorder %s806_s30, 0  ;;  %p1274_p2 = scmp.eq.s32.totalorder %s806_s30, 1 }
   0xa   : > { %p214_p3 = scmp.eq.s32.totalorder %s807_s8, 1  ;;  %p808_p5 = scmp.ge.s32.totalorder %s1184_s29, 1 }
   0xb   : > { %s1540_s9 = scalar_select %p1270_p1, 1, 0 }
   0xc   : > { %p1280_p4 = por %p1270_p1, %p58_p0  ;;  %p1285_p6 = por %p214_p3, %p58_p0 }
   0xd   : > { %p221_p7 = scmp.lt.s32.totalorder %s1184_s29, 3  ;;  %s1186_s14 = smov [#allocation6]  }
   0xe   : > { %s1542_s11 = scalar_select %p1280_p4, 1, 0 }
   0xf   : > { %s1543_s12 = scalar_select %p1285_p6, 1, 0 }
  0x10   : > { %p1290_p8 = pnand %p808_p5, %p221_p7  ;;  %s239_s15 = sshll.u32 %s1186_s14, 4  ;;  %s1294_s15 = int_to_ptr.vmem [resolvable:$true] %s239_s15 }
  0x11   : > { %1544 = sst [smem:[#allocation14_spill]] %s1543_s12  ;;  %s1187_s17 = smov [#allocation8]  }
  0x12   : > { %p918_p9 = pneg %p1290_p8  ;;  %s255_s18 = sshll.u32 %s1187_s17, 4  ;;  %s1305_s18 = int_to_ptr.vmem [resolvable:$true] %s255_s18 }
  0x13   : > { %s1012_s21 = scalar_lea.hbm %s1528_s3, 1024 }
  0x14   : > { %p1301_p11 = pnand %p918_p9, %p1270_p1  ;;  %p1013_p12 = scmp.ne.s32.totalorder %s1528_s3, %s1012_s21 }
  0x15   : > { %p1019_p5 = scmp.lt.u32.totalorder %s1012_s21, %s1528_s3 }
  0x16   : > { %p1014_p13 = pneg %p1301_p11 }
  0x18   : > { %p1015_p0 = pnand %p1014_p13, %p1013_p12 }
  0x1a   : > { %p1016_p3 = pneg %p1015_p0 }
  0x1c   : > { %p1021_p7 = pnand %p1019_p5, %p1016_p3 }
  0x1e   : > { %1024 = shalt.err (!%p1021_p7)
}
  0x1f   : > { %s1025_s14 = scalar_lea.vmem %s1294_s15, 1024  ;;  %p1033_p1 = scmp.lt.s32.totalorder %s1294_s15, %s1294_s15 }
  0x20   : > { %p1026_p9 = scmp.ne.s32.totalorder %s1294_s15, %s1025_s14  ;;  %p1034_p12 = scmp.lt.s32.totalorder %s1025_s14, %s1025_s14 }
  0x22   : > { %p1028_p10 = pnand %p1026_p9, %p1014_p13  ;;  %p1035_p0 = por %p1034_p12, %p1033_p1 }
  0x24   : > { %p1029_p6 = pneg %p1028_p10 }
  0x26   : > { %p1036_p4 = pnand %p1035_p0, %p1029_p6 }
  0x28   : > { %1039 = shalt.err (!%p1036_p4)
}
  0x29   : > { %s1188_s17 = smov 64   ;;  %s1189_s19 = smov 4  }
  0x2a   : > { %921 = dma.hbm_to_vmem [thread:$0]  (!%p1301_p11), %s1528_s3, 1024, %s1294_s15, [#allocation7], %s1188_s17, %s1188_s17, %s1189_s19  }
  0x2b   : > { %s1040_s30 = scalar_lea.hbm %s1530_s5, 1024 }
  0x2c   : > { %p1041_p1 = scmp.ne.s32.totalorder %s1530_s5, %s1040_s30  ;;  %p1047_p10 = scmp.lt.u32.totalorder %s1040_s30, %s1530_s5 }
  0x2e   : > { %p1043_p4 = pnand %p1041_p1, %p1014_p13 }
  0x30   : > { %p1044_p6 = pneg %p1043_p4 }
  0x32   : > { %p1049_p3 = pnand %p1047_p10, %p1044_p6 }
  0x34   : > { %1052 = shalt.err (!%p1049_p3)
}
  0x35   : > { %s1053_s15 = scalar_lea.vmem %s1305_s18, 1024  ;;  %p1061_p12 = scmp.lt.s32.totalorder %s1305_s18, %s1305_s18 }
  0x36   : > { %p1054_p5 = scmp.ne.s32.totalorder %s1305_s18, %s1053_s15  ;;  %p1062_p0 = scmp.lt.s32.totalorder %s1053_s15, %s1053_s15 }
  0x38   : > { %p1056_p7 = pnand %p1054_p5, %p1014_p13  ;;  %p1063_p1 = por %p1062_p0, %p1061_p12 }
  0x3a   : > { %p1057_p9 = pneg %p1056_p7 }
  0x3c   : > { %p1064_p4 = pnand %p1063_p1, %p1057_p9 }
  0x3e   : > { %1067 = shalt.err (!%p1064_p4)
}
  0x3f   : > { %924 = dma.hbm_to_vmem [thread:$0]  (!%p1301_p11), %s1530_s5, 1024, %s1305_s18, [#allocation7], %s1188_s17, %s1188_s17, %s1189_s19  }
  0x40   : > { %s36_s20 = sadd.s32 1, %s1180_s28  ;;  %s45_s21 = sadd.s32 1, %s1172_s26 }
  0x41   : > { %p38_p13 = scmp.ge.s32.totalorder %s36_s20, 2  ;;  %p52_p6 = scmp.ne.s32.totalorder %s1172_s26, %s1168_s25 }
  0x42   : > { %p53_p10 = scmp.eq.s32.totalorder %s1184_s29, 0  ;;  %p935_p3 = scmp.lt.s32.totalorder %s1184_s29, 2 }
  0x43   : > { %s1562_s20 = smov (%p38_p13, %s36_s20), 0  ;;  %p1369_p7 = por %p1274_p2, %p52_p6 }
  0x44   : > { %p54_p5 = por %p53_p10, %p52_p6  ;;  %s40_s22 = ssub.s32 %s1180_s28, %s1562_s20 }
  0x45   : > { %s1547_s16 = scalar_select %p1369_p7, 1, 0 }
  0x46   : > { %s272_s23 = sand.u32 1, %s1172_s26   ;;  %p43_p9 = scmp.eq.s32.totalorder %s40_s22, 0 }
  0x47   : > { %s812_s18 = sshll.u32 %s272_s23, 2  ;;  %s839_s17 = sshll.u32 %s1180_s28, 6 }
  0x48   : > { %s1378_s19 = scalar_select %p43_p9, %s1172_s26, %s45_s21  }
  0x49   : > { %s1383_s14 = scalar_lea.hbm %s1525_s0, %s839_s17  ;;  %s276_s10 = scalar_lea.vmem [#allocation3], %s812_s18 }
  0x4a   : > { %s286_s15 = sshll.u32 %s276_s10, 4  ;;  %p1387_p2 = pnand %p935_p3, %p54_p5  ;;  %s1391_s15 = int_to_ptr.vmem [resolvable:$true] %s286_s15 }
  0x4b   : > { %s273_s12 = scalar_lea.sflag [#allocation4], %s272_s23  ;;  %s1068_s21 = scalar_lea.hbm %s1383_s14, 64 }
  0x4c   : > { %p1069_p11 = scmp.ne.s32.totalorder %s1383_s14, %s1068_s21  ;;  %p1070_p12 = pneg %p1387_p2 }
  0x4d   : > { %s1073_s17 = scalar_lea.hbm %s1525_s0, 128  ;;  %p1074_p4 = scmp.lt.u32.totalorder %s1383_s14, %s1525_s0 }
  0x4e   : > { %p1071_p0 = pnand %p1070_p12, %p1069_p11  ;;  %p1075_p13 = scmp.lt.u32.totalorder %s1073_s17, %s1068_s21 }
  0x4f   : > { %p1077_p10 = scmp.lt.u32.totalorder %s1068_s21, %s1383_s14 }
  0x50   : > { %p1072_p1 = pneg %p1071_p0  ;;  %p1076_p6 = por %p1075_p13, %p1074_p4 }
  0x52   : > { %p1078_p3 = por %p1077_p10, %p1076_p6 }
  0x54   : > { %p1079_p5 = pnand %p1078_p3, %p1072_p1 }
  0x56   : > { %1082 = shalt.err (!%p1079_p5)
}
  0x57   : > { %s1083_s23 = scalar_lea.vmem %s1391_s15, 64  ;;  %s1190_s10 = smov [#allocation3]  }
  0x58   : > { %p1084_p9 = scmp.ne.s32.totalorder %s1391_s15, %s1083_s23  ;;  %s1088_s22 = sshll.u32 %s1190_s10, 4  ;;  %s1089_s22 = int_to_ptr.vmem [resolvable:$false] %s1088_s22 }
  0x59   : > { %s1090_s18 = scalar_lea.vmem %s1089_s22, 128  ;;  %p1091_p7 = scmp.lt.s32.totalorder %s1391_s15, %s1089_s22 }
  0x5a   : > { %p1086_p11 = pnand %p1084_p9, %p1070_p12  ;;  %p1092_p4 = scmp.lt.s32.totalorder %s1090_s18, %s1083_s23 }
  0x5c   : > { %p1087_p0 = pneg %p1086_p11  ;;  %p1093_p13 = por %p1092_p4, %p1091_p7 }
  0x5e   : > { %p1094_p6 = pnand %p1093_p13, %p1087_p0 }
  0x60   : > { %1097 = shalt.err (!%p1094_p6)
}
  0x61   : > { %928 = dma.hbm_to_vmem [thread:$0]  (!%p1387_p2), %s1383_s14, 64, %s1391_s15, %s273_s12  }
  0x62   : > { %295 = sbr.rel (%p1290_p8) target bundleno = 1079 (0x437), region = 48  ;;  %s1421_s21 = sand.u32 (!%p1290_p8), 1, %s1168_s25  }
  0x63   : > { %s816_s17 = sshll.u32 (!%p1290_p8), %s1421_s21, 2  ;;  %s298_s30 = scalar_lea.sflag (!%p1290_p8), [#allocation4], %s1421_s21 }
  0x64   : > { %s301_s8 = scalar_lea.vmem (!%p1290_p8), [#allocation3], %s816_s17  ;;  %p1549_p7 = scmp.ne.s32.totalorder (!%p1290_p8), %s1542_s11, 0 }
  0x69   : > { %1151 = dma.done.wait (%p1549_p7), %s298_s30, 64  }
  0x6a   : > { %1153 = vsyncadd (%p1549_p7), %s298_s30, 4294967232  ;;  %p1550_p12 = scmp.ne.s32.totalorder %s1540_s9, 0 }
  0x6c   : > { %1155 = dma.done.wait (%p1550_p12), [#allocation7], 2048  }
  0x6d   : > { %1157 = vsyncadd (%p1550_p12), [#allocation7], 4294965248  ;;  %vm353_vm0 = vcmask 1043456   ;;  %v347_v0 = vld [vmem:[%s301_s8] sm:$0xf]  ;;  %v1191_v6 = vmov 0   ;;  %v360_v7 = vlaneseq }
  0x6e   : > { %v349_v1 = vunpack.c.l.bf16 %v347_v0  ;;  %995 = vset.pattern.permute.xlu0 %v1191_v6  ;;  %vm345_vm1 = vcmask 24576   ;;  %v1192_v10 = vmov 0.0   ;;  %v1193_v12 = vmov 1966171168   ;;  %v433_v31 = vld [vmem:[%s1526_s1] sm:$0x3] }
  0x6f   : > { %v361_v8 = vshrl.u32 %v360_v7, 7  ;;  %v404_v9 = vand.u32 127, %v360_v7  ;;  %346 = vst.msk [vmem:[#allocation2] sm:$0x1] %vm345_vm1, %v1192_v10  ;;  %860 = vmatprep.subr.bf16.mxu0 %v1192_v10  ;;  %866 = vmatprep.subr.bf16.mxu1 %v1192_v10  ;;  %v379_v13 = vunpack.c.l.s4 %v1193_v12  ;;  %vm438_vm2 = vcmask 1041408   ;;  %v996_v33 = vld [vmem:[#allocation6] sm:$0xff]  }
  0x70   : > { %v351_v2 = vcombine.high %v349_v1, %v349_v1  ;;  %v354_v3 = vsel %vm353_vm0, %v349_v1, 0.0  ;;  %v440_v32 = vsel %vm438_vm2, %v433_v31, 0  ;;  %vm1194_vm3 = vmmov 0   ;;  %867 = vmatpush3.bf16.msra.mxu1 %v996_v33  ;;  %v997_v34 = vld [vmem:[#allocation6 + $0x8] sm:$0xff]   ;;  %v998_v35 = vld [vmem:[#allocation6 + $0x10] sm:$0xff]   ;;  %v999_v36 = vld [vmem:[#allocation6 + $0x18] sm:$0xff]  }
  0x71   : > { %v407_v11 = vsub.s32 %v404_v9, %v361_v8  ;;  %v380_v14 = vunpack.c.0.s8 %v379_v13  ;;  %v362_v15 = vsub.s32 0, %v361_v8  ;;  %v366_v16 = vsub.s32 1, %v361_v8  ;;  %862 = vmatprep.mubr.msk.bf16.mxu0 %vm1194_vm3, %v1192_v10  ;;  %882 = vmatprep.mubr.msk.bf16.mxu1 %vm1194_vm3, %v1192_v10  ;;  %v1000_v37 = vld [vmem:[#allocation6 + $0x20] sm:$0xff]   ;;  %v1001_v38 = vld [vmem:[#allocation6 + $0x28] sm:$0xff]   ;;  %v1002_v47 = vld [vmem:[#allocation6 + $0x30] sm:$0xff]   ;;  %s836_s10 = sshll.u32 %s1176_s27, 4 }
  0x72   : > { %v355_v4 = vsel %vm353_vm0, %v351_v2, 0.0  ;;  %v370_v17 = vsub.s32 2, %v361_v8  ;;  %v374_v18 = vsub.s32 3, %v361_v8  ;;  %861 = vmatpush3.bf16.msra.mxu0 %v440_v32  ;;  %868 = vmatprep.subr.bf16.mxu1 %v1192_v10  ;;  %vm434_vm4 = vcmask 31744   ;;  %v1003_v48 = vld [vmem:[#allocation6 + $0x38] sm:$0xff]   ;;  %v1004_v49 = vld [vmem:[#allocation8] sm:$0xff]   ;;  %s1476_s8 = scalar_lea.hbm %s1532_s7, %s836_s10 }
  0x73   : > { %v356_v5 = vadd.f32 %v355_v4, %v354_v3  ;;  %v383_v20 = vsub.s32 %v380_v14, %v361_v8  ;;  %886 = vmatprep.subr.bf16.mxu0 %v1192_v10  ;;  %v1005_v50 = vld [vmem:[#allocation8 + $0x8] sm:$0xff]   ;;  %v1006_v51 = vld [vmem:[#allocation8 + $0x10] sm:$0xff]   ;;  %v1007_v52 = vld [vmem:[#allocation8 + $0x18] sm:$0xff]   ;;  %s338_s22 = scalar_lea.vmem [#allocation9], %s1421_s21  ;;  %s698_s9 = scalar_lea.sflag [#allocation5], %s1421_s21 }
  0x74   : > { %869 = vmatpush3.bf16.msra.mxu1 %v997_v34  ;;  %v1008_v53 = vld [vmem:[#allocation8 + $0x20] sm:$0xff]   ;;  %v1009_v54 = vld [vmem:[#allocation8 + $0x28] sm:$0xff]   ;;  %v431_v55 = vld [vmem:[%s1527_s2] sm:$0x1]  ;;  %s710_s18 = sshll.u32 %s338_s22, 4  ;;  %p1551_p2 = scmp.ne.s32.totalorder %s1547_s16, 0  ;;  %s1478_s18 = int_to_ptr.vmem [resolvable:$true] %s710_s18 }
  0x75   : > { %357 = vadd.xlane.f32.xlu0 %v356_v5  ;;  %870 = vmatprep.subr.bf16.mxu1 %v1192_v10  ;;  %v1010_v63 = vld [vmem:[#allocation8 + $0x30] sm:$0xff]   ;;  %v1011_v0 = vld [vmem:[#allocation8 + $0x38] sm:$0xff]   ;;  %s1098_s27 = scalar_lea.vmem %s1478_s18, 16  ;;  %s1195_s11 = smov [#allocation9]  }
  0x76   : > { %v348_v42 = vld [vmem:[#allocation2] sm:$0x1]  ;;  %p1099_p8 = scmp.ne.s32.totalorder %s1478_s18, %s1098_s27  ;;  %s1102_s13 = sshll.u32 %s1195_s11, 4  ;;  %s1103_s13 = int_to_ptr.vmem [resolvable:$false] %s1102_s13 }
  0x77   : > { %v483_v1 = vld [vmem:[%s1529_s4] sm:$0x1]  ;;  %s1104_s14 = scalar_lea.vmem %s1103_s13, 32  ;;  %p1105_p3 = scmp.lt.s32.totalorder %s1478_s18, %s1103_s13 }
  0x78   : > { %871 = vmatpush3.bf16.msra.mxu1 %v998_v35  ;;  %v590_v9 = vld [vmem:[%s1531_s6] sm:$0x1]  ;;  %p1100_p1 = pnand %p1099_p8, %p1551_p2  ;;  %p1106_p5 = scmp.lt.s32.totalorder %s1104_s14, %s1098_s27 }
  0x79   : > { %872 = vmatprep.subr.bf16.mxu1 %v1192_v10 }
  0x7a   : > { %p1101_p10 = pneg %p1100_p1  ;;  %p1107_p9 = por %p1106_p5, %p1105_p3 }
  0x7c   : > { %873 = vmatpush3.bf16.msra.mxu1 %v999_v36  ;;  %p1108_p11 = pnand %p1107_p9, %p1101_p10 }
  0x7d   : > { %874 = vmatprep.subr.bf16.mxu1 %v1192_v10 }
  0x80   : > { %875 = vmatpush3.bf16.msra.mxu1 %v1000_v37 }
  0x81   : > { %876 = vmatprep.subr.bf16.mxu1 %v1192_v10 }
  0x84   : > { %877 = vmatpush3.bf16.msra.mxu1 %v1001_v38 }
  0x85   : > { %878 = vmatprep.subr.bf16.mxu1 %v1192_v10 }
  0x88   : > { %879 = vmatpush3.bf16.msra.mxu1 %v1002_v47 }
  0x89   : > { %880 = vmatprep.subr.bf16.mxu1 %v1192_v10 }
  0x8c   : > { %881 = vmatpush3.bf16.msra.mxu1 %v1003_v48 }
 0x102   : > { %v358_v19 = vpop.xlane.xlu0 %357 }
 0x103   : > { %v363_v21 = vrot.slane %v358_v19, %v362_v15  ;;  %v367_v22 = vrot.slane %v358_v19, %v366_v16  ;;  %v371_v23 = vrot.slane %v358_v19, %v370_v17  ;;  %v375_v24 = vrot.slane %v358_v19, %v374_v18 }
 0x105   : > { %v376_v25 = vcombine.low %v363_v21, %v367_v22  ;;  %v377_v26 = vcombine.low %v371_v23, %v375_v24 }
 0x107   : > { %v384_v27 = vrot.slane %v376_v25, %v383_v20  ;;  %v391_v28 = vrot.slane %v377_v26, %v383_v20 }
 0x109   : > { %v392_v29 = vcombine.low %v384_v27, %v391_v28 }
 0x10b   : > { %v399_v30 = vrot.slane %v392_v29, %v383_v20 }
 0x10d   : > { %401 = vperm.xlu0 %995, %v399_v30  }
 0x18c   : > { %v402_v39 = vpop.permute.xlu0 %401 }
 0x18d   : > { %v408_v40 = vrot.slane %v402_v39, %v407_v11 }
 0x18f   : > { %v415_v41 = vrot.slane %v408_v40, %v383_v20 }
 0x191   : > { %v422_v43 = vrot.slane %v415_v41, %v383_v20 }
 0x193   : > { %v424_v44 = vadd.f32 %v422_v43, %v348_v42 }
 0x195   : > { %426 = vst.msk [vmem:[#allocation2] sm:$0x1] %vm345_vm1, %v424_v44 }
 0x19c   : > { %v430_v45 = vld [vmem:[#allocation2] sm:$0x1] }
 0x19d   : > { %v432_v46 = vpack.c.bf16 %v430_v45, %v430_v45 }
 0x19f   : > { %863 = vmatmul.mubr.msk.bf16.vlgmr.msra.gmra.mrb[0].mxu0 %vm434_vm4, %v432_v46 }
 0x1a0   : > { %902 = vmatprep.mubr.msk.bf16.mxu0 %vm1194_vm3, %v1192_v10  ;;  %887 = vmatpush3.bf16.msra.mxu0 %v1004_v49 }
 0x1a1   : > { %888 = vmatprep.subr.bf16.mxu0 %v1192_v10 }
 0x1a4   : > { %889 = vmatpush3.bf16.msra.mxu0 %v1005_v50 }
 0x1a5   : > { %890 = vmatprep.subr.bf16.mxu0 %v1192_v10 }
 0x1a8   : > { %891 = vmatpush3.bf16.msra.mxu0 %v1006_v51 }
 0x1a9   : > { %892 = vmatprep.subr.bf16.mxu0 %v1192_v10 }
 0x1ac   : > { %893 = vmatpush3.bf16.msra.mxu0 %v1007_v52 }
 0x1ad   : > { %894 = vmatprep.subr.bf16.mxu0 %v1192_v10 }
 0x1b0   : > { %895 = vmatpush3.bf16.msra.mxu0 %v1008_v53 }
 0x1b1   : > { %896 = vmatprep.subr.bf16.mxu0 %v1192_v10 }
 0x1b4   : > { %897 = vmatpush3.bf16.msra.mxu0 %v1009_v54 }
 0x1b5   : > { %898 = vmatprep.subr.bf16.mxu0 %v1192_v10 }
 0x1b8   : > { %899 = vmatpush3.bf16.msra.mxu0 %v1010_v63 }
 0x1b9   : > { %900 = vmatprep.subr.bf16.mxu0 %v1192_v10 }
 0x1bc   : > { %901 = vmatpush3.bf16.msra.mxu0 %v1011_v0 }
 0x272   : > { %v476_v56 = vpop.f32.mrb[0].mxu0 }
 0x273   : > { %v477_v57 = vadd.f32 %v476_v56, %v431_v55  ;;  %v864_v58 = vpop.f32.mrb[1].mxu0 }
 0x274   : > { %v479_v59 = vpop.f32.mrb[2].mxu0 }
 0x275   : > { %v482_v60 = vmax.f32 %v477_v57, 0.0  ;;  %v865_v61 = vpop.f32.mrb[3].mxu0 }
 0x277   : > { %v484_v62 = vpack.c.bf16 %v482_v60, %v482_v60 }
 0x279   : > { %883 = vmatmul.mubr.bf16.vlgmr.msra.gmra.mrb[0].mxu1 %v484_v62 }
 0x34c   : > { %v583_v2 = vpop.f32.mrb[0].mxu1 }
 0x34d   : > { %v584_v3 = vadd.f32 %v583_v2, %v483_v1  ;;  %v884_v4 = vpop.f32.mrb[1].mxu1 }
 0x34e   : > { %v586_v5 = vpop.f32.mrb[2].mxu1 }
 0x34f   : > { %v589_v6 = vmax.f32 %v584_v3, 0.0  ;;  %v885_v7 = vpop.f32.mrb[3].mxu1 }
 0x351   : > { %v591_v8 = vpack.c.bf16 %v589_v6, %v589_v6 }
 0x353   : > { %903 = vmatmul.mubr.bf16.vlgmr.msra.gmra.mrb[4].mxu0 %v591_v8 }
 0x426   : > { %v690_v10 = vpop.f32.mrb[4].mxu0 }
 0x427   : > { %v691_v11 = vadd.f32 %v690_v10, %v590_v9  ;;  %v904_v12 = vpop.f32.mrb[5].mxu0 }
 0x428   : > { %v693_v13 = vpop.f32.mrb[6].mxu0 }
 0x429   : > { %696 = vst [vmem:[%s338_s22] sm:$0x1] %v691_v11  ;;  %v905_v14 = vpop.f32.mrb[7].mxu0 }
 0x42a   : > { %1111 = shalt.err (!%p1108_p11)
}
 0x42b   : > { %s1112_s21 = scalar_lea.hbm %s1476_s8, 16  ;;  %s1116_s12 = scalar_lea.hbm %s1532_s7, 32 }
 0x42c   : > { %p1113_p0 = scmp.ne.s32.totalorder %s1476_s8, %s1112_s21  ;;  %p1117_p6 = scmp.lt.u32.totalorder %s1476_s8, %s1532_s7 }
 0x42d   : > { %p1118_p7 = scmp.lt.u32.totalorder %s1116_s12, %s1112_s21  ;;  %p1120_p8 = scmp.lt.u32.totalorder %s1112_s21, %s1476_s8 }
 0x42e   : > { %p1114_p4 = pnand %p1113_p0, %p1551_p2 }
 0x42f   : > { %p1119_p12 = por %p1118_p7, %p1117_p6 }
 0x430   : > { %p1115_p13 = pneg %p1114_p4 }
 0x431   : > { %p1121_p1 = por %p1120_p8, %p1119_p12 }
 0x433   : > { %p1122_p10 = pnand %p1121_p1, %p1115_p13 }
 0x435   : > { %1125 = shalt.err (!%p1122_p10)
}
 0x436   : > { %916 = dma.vmem_to_hbm [thread:$0]  (%p1551_p2), %s1478_s18, 16, %s1476_s8, %s698_s9  }
 0x437 PF: > { %s1552_s22 = sld [smem:[#allocation13_spill]]  ;;  %s1553_s17 = sld [smem:[#allocation14_spill]] }
 0x438   : > { %p1555_p5 = scmp.ge.s32.totalorder %s1184_s29, 2 }
 0x43d   : > { %s722_s30 = sand.u32 1, %s1552_s22   ;;  %p1554_p3 = scmp.ne.s32.totalorder %s1553_s17, 0 }
 0x43e   : > { %s723_s27 = scalar_lea.sflag [#allocation5], %s722_s30 }
 0x43f   : > { %p930_p9 = pnand %p1555_p5, %p1554_p3 }
 0x441   : > { %1159 = dma.done.wait (!%p930_p9), %s723_s27, 16  }
 0x442   : > { %1161 = vsyncadd (!%p930_p9), %s723_s27, 4294967280  ;;  %s24_s29 = sadd.s32 1, %s1184_s29   ;;  %s1556_s24 = smov %s1168_s25 }
 0x443   : > { %p21_p11 = scmp.ge.s32.totalorder %s24_s29, 4   ;;  %s1557_s25 = smov %s1172_s26 }
 0x444   : > { %s1558_s26 = smov %s1378_s19  ;;  %s1559_s27 = smov %s1180_s28 }
 0x445   : > { %s1560_s28 = smov %s1562_s20  ;;  %23 = sbr.rel (!%p21_p11) target bundleno = 7 (0x7), region = 109 }
 0x44c   :  { %727 = vsyncpa [#allocation4], 1 }
 0x44d   :  { %729 = vsyncpa [#allocation4 + $0x1], 1 }
 0x44e   :  { %730 = vsyncpa [#allocation7], 1 }
 0x44f   :  { %731 = vsyncpa [#allocation5], 1 }
 0x450   :  { %733 = vsyncpa [#allocation5 + $0x1], 1 }

</bundles_post_ra>
